<compile_context>
chip_gen: v6e
topology: v6e:2x2x1
jax: 0.10.0
libtpu: 0.0.40
codegen_flags: <defaults>
</compile_context>

<pallas_src>
import functools

import jax
import jax.numpy as jnp
from jax.experimental import pallas as pl
from jax.experimental.pallas import tpu as pltpu


def _round_up(x, m):
    return -(-x // m) * m


def _mse_ploss_kernel(pred_ref, tgt_ref, out_ref, *, num_candidates, inv_c):
    # pred_ref: [TILE_N, C*D]  (one contiguous lane-dense row per sample)
    # tgt_ref : [TILE_N, D]
    # out_ref : [1, 1, TILE_N] (lane-dense per-step output slab)
    pred = pred_ref[...].astype(jnp.float32)
    tgt = tgt_ref[...].astype(jnp.float32)
    if num_candidates > 1:
        # Broadcast the target along the flattened candidate axis (lane concat).
        tgt = jnp.concatenate([tgt] * num_candidates, axis=-1)   # [TILE_N, C*D]
    diff = pred - tgt
    per_sample = jnp.sum(diff * diff, axis=-1) * inv_c            # [TILE_N]
    out_ref[...] = per_sample.reshape(out_ref.shape)


def mse_ploss(pred_traj, tgt_traj):
    """pred_traj: [N, C, T, 2], tgt_traj: [N, T, 2] -> ploss: [N] (float32)."""
    if pred_traj.ndim != 4:
        raise ValueError("pred_traj must be [N, C, T, 2]")
    if tgt_traj.ndim != 3:
        raise ValueError("tgt_traj must be [N, T, 2]")
    N, C, T, two = pred_traj.shape
    if two != 2 or tgt_traj.shape != (N, T, 2):
        raise ValueError("pred_traj / tgt_traj shape mismatch")
    D = T * 2
    CD = C * D

    # Flatten trailing dims onto the lane axis (contiguous collapse, free).
    pred = pred_traj.reshape(N, CD)
    tgt = tgt_traj.reshape(N, D)

    # --- Generation-aware VMEM budget (v7x: 64 MiB physical; v5e/v6e: 128 MiB).
    try:
        vmem_cap = int(pltpu.get_tpu_info().vmem_capacity_bytes)
    except Exception:
        vmem_cap = 64 * 1024 * 1024          # conservative (v7x-sized) fallback
    vmem_limit = (vmem_cap * 3) // 4         # ~48 MiB on v7x, ~96 MiB on v5e/v6e

    # --- Tile sizing from the PADDED VMEM footprint (lane dim padded to 128).
    in_itemsize = jnp.dtype(pred_traj.dtype).itemsize
    pred_row = _round_up(CD, 128) * in_itemsize      # padded bytes / sample (pred)
    tgt_row = _round_up(D, 128) * in_itemsize        # padded bytes / sample (tgt)
    f32_row = _round_up(CD, 128) * 4                 # in-kernel f32 temporaries
    # 2x for the double-buffered pipelined inputs + a few f32 temps per row.
    per_row = 2 * (pred_row + tgt_row) + 3 * f32_row

    budget = max(vmem_limit - (2 << 20), 4 << 20)
    tile_n_max = max(128, (budget // per_row) // 128 * 128)
    # Target ~16 MiB of padded pred data per tile (amortizes per-step overhead).
    tile_n_target = max(128, ((16 << 20) // pred_row) // 128 * 128)
    tile_n = min(tile_n_max, tile_n_target)

    if tile_n >= N:
        if N > 256:
            # Force >= 2 tiles so the "parallel" grid axis can split across
            # both TensorCores on v7x.
            tile_n = _round_up(-(-N // 2), 128)
        else:
            tile_n = N                        # single whole-array block
    num_tiles = -(-N // tile_n)
    # NOTE: no jnp.pad -- the ragged last block may read past N; those rows'
    # outputs are undefined and are sliced off by [:N] below.  Keep that
    # invariant if the output handling ever changes.

    kernel = functools.partial(_mse_ploss_kernel, num_candidates=C, inv_c=1.0 / C)

    cost = pl.CostEstimate(
        flops=3 * N * CD,
        transcendentals=0,
        bytes_accessed=N * CD * in_itemsize + N * D * in_itemsize + N * 4,
    )

    out = pl.pallas_call(
        kernel,
        out_shape=jax.ShapeDtypeStruct((num_tiles, 1, tile_n), jnp.float32),
        grid_spec=pltpu.PrefetchScalarGridSpec(
            num_scalar_prefetch=0,
            grid=(num_tiles,),
            in_specs=[
                pl.BlockSpec((tile_n, CD), lambda i: (i, 0)),
                pl.BlockSpec((tile_n, D), lambda i: (i, 0)),
            ],
            # Each grid step owns its own (1, 1, TILE_N) lane-dense output
            # block -> unmasked stores, no cross-step dependency.
            out_specs=pl.BlockSpec((1, 1, tile_n), lambda i: (i, 0, 0)),
        ),
        compiler_params=pltpu.CompilerParams(
            dimension_semantics=("parallel",),   # megacore-safe
            vmem_limit_bytes=vmem_limit,
        ),
        cost_estimate=cost,
    )(pred, tgt)

    return out.reshape(num_tiles * tile_n)[:N]


if __name__ == "__main__":
    key = jax.random.PRNGKey(0)
    k1, k2 = jax.random.split(key)

    N, C, T = 2, 4, 8  # batch, candidate trajectories, timesteps
    pred_traj = jax.random.normal(k1, (N, C, T, 2), dtype=jnp.float32)
    tgt_traj = jax.random.normal(k2, (N, T, 2), dtype=jnp.float32)

    ploss = jax.block_until_ready(mse_ploss(pred_traj, tgt_traj))

    # Pure-JAX reference check (same math as the PyTorch module).
    ref = jnp.mean(
        jnp.sum((pred_traj - tgt_traj[:, None, :, :]) ** 2, axis=(2, 3)), axis=1
    )
    assert ploss.shape == (N,)
    assert jnp.allclose(ploss, ref, rtol=1e-5, atol=1e-5)

    print("KERNEL_OK")
</pallas_src>

<mosaic_0001>
module attributes {stable_mosaic.version = 11 : i64} {
  func.func @_mse_ploss_kernel(%arg0: i32, %arg1: memref<2x64xf32, #tpu.memory_space<vmem>>, %arg2: memref<2x16xf32, #tpu.memory_space<vmem>>, %arg3: memref<1x1x2xf32, #tpu.memory_space<vmem>>) attributes {dimension_semantics = [#tpu.dimension_semantics<parallel>], iteration_bounds = array<i64: 1>, scalar_prefetch = 0 : i64, scratch_operands = 0 : i64, tpu.core_type = #tpu.core_type<tc>, window_params = [{transform_indices = @transform_0, window_bounds = array<i64: 2, 64>}, {transform_indices = @transform_1, window_bounds = array<i64: 2, 16>}, {transform_indices = @transform_2, window_bounds = array<i64: 1, 1, 2>}]} {
    %c0 = arith.constant 0 : index
    %c0_0 = arith.constant 0 : index
    %0 = vector.load %arg1[%c0, %c0_0] : memref<2x64xf32, #tpu.memory_space<vmem>>, vector<2x64xf32>
    %c0_1 = arith.constant 0 : index
    %c0_2 = arith.constant 0 : index
    %1 = vector.load %arg2[%c0_1, %c0_2] : memref<2x16xf32, #tpu.memory_space<vmem>>, vector<2x16xf32>
    %2 = tpu.concatenate %1, %1, %1, %1 in 1 : vector<2x16xf32>, vector<2x16xf32>, vector<2x16xf32>, vector<2x16xf32> -> vector<2x64xf32>
    %3 = arith.subf %0, %2 : vector<2x64xf32>
    %4 = arith.mulf %3, %3 : vector<2x64xf32>
    %cst = arith.constant dense<0.000000e+00> : vector<2xf32>
    %5 = vector.multi_reduction <add>, %4, %cst [1] : vector<2x64xf32> to vector<2xf32>
    %cst_3 = arith.constant 2.500000e-01 : f32
    %6 = vector.broadcast %cst_3 : f32 to vector<2xf32>
    %7 = arith.mulf %5, %6 : vector<2xf32>
    %8 = vector.shape_cast %7 : vector<2xf32> to vector<1x1x2xf32>
    %c0_4 = arith.constant 0 : index
    %c0_5 = arith.constant 0 : index
    %c0_6 = arith.constant 0 : index
    %9 = vector.load %arg3[%c0_4, %c0_5, %c0_6] : memref<1x1x2xf32, #tpu.memory_space<vmem>>, vector<1x1x2xf32>
    tpu.vector_store %arg3[%c0_4, %c0_5, %c0_6], %8 {strides = array<i32>} : memref<1x1x2xf32, #tpu.memory_space<vmem>>, vector<1x1x2xf32>,
    return
  }
  func.func @transform_0(%arg0: i32) -> (i32, i32) {
    %c0_i32 = arith.constant 0 : i32
    %c0_i32_0 = arith.constant 0 : i32
    return %arg0, %c0_i32 : i32, i32
  }
  func.func @transform_1(%arg0: i32) -> (i32, i32) {
    %c0_i32 = arith.constant 0 : i32
    %c0_i32_0 = arith.constant 0 : i32
    return %arg0, %c0_i32 : i32, i32
  }
  func.func @transform_2(%arg0: i32) -> (i32, i32, i32) {
    %c0_i32 = arith.constant 0 : i32
    %c0_i32_0 = arith.constant 0 : i32
    %c0_i32_1 = arith.constant 0 : i32
    return %arg0, %c0_i32, %c0_i32_0 : i32, i32, i32
  }
}

</mosaic_0001>

<bundles_post_ra>
// kernel: tpu_custom_call.1
= control target key start
LH: loop header
LB: loop body
LE: loop exit
PB: predicated region body
PF: predicated region fallthrough
CT: control target
= control target key end

     0   :  { %7 = vsyncpa [#allocation3], 0  ;;  %s189_s0 = inlined_call_operand.hbm [shape: f32[2,64], index: 0, kind: input, shape index: {}]   ;;  %s190_s1 = inlined_call_operand.hbm [shape: f32[2,16], index: 1, kind: input, shape index: {}]   ;;  %s191_s2 = inlined_call_operand.hbm [shape: f32[1,1,2], index: 2, kind: output, shape index: {}]  }
   0x1   :  { %8 = vsyncpa [#allocation6], 0 }
   0x2   :  { %9 = vsyncpa [#allocation4], 0  ;;  %s159_s9 = smov [#allocation2]   ;;  %s160_s11 = smov [#allocation5]  }
   0x3   :  { %s16_s10 = sshll.u32 %s159_s9, 4  ;;  %s26_s12 = sshll.u32 %s160_s11, 4  ;;  %s17_s10 = int_to_ptr.vmem [resolvable:$true] %s16_s10  ;;  %s27_s12 = int_to_ptr.vmem [resolvable:$true] %s26_s12 }
   0x4   :  { %s101_s13 = scalar_lea.vmem %s17_s10, 32  ;;  %p106_p1 = scmp.lt.s32.totalorder %s17_s10, %s17_s10 }
   0x5   :  { %p102_p0 = scmp.ne.s32.totalorder %s17_s10, %s101_s13  ;;  %p107_p2 = scmp.lt.s32.totalorder %s101_s13, %s101_s13 }
   0x7   :  { %p108_p3 = por %p107_p2, %p106_p1 }
   0x9   :  { %p109_p4 = pnand %p108_p3, %p102_p0 }
   0xb   :  { %112 = shalt.err (!%p109_p4)
}
   0xc   :  { %19 = dma.hbm_to_vmem [thread:$0]  %s189_s0, 32, %s17_s10, [#allocation3]  }
   0xd   :  { %s121_s16 = scalar_lea.vmem %s27_s12, 32  ;;  %p126_p6 = scmp.lt.s32.totalorder %s27_s12, %s27_s12 }
   0xe   :  { %p122_p5 = scmp.ne.s32.totalorder %s27_s12, %s121_s16  ;;  %p127_p7 = scmp.lt.s32.totalorder %s121_s16, %s121_s16 }
  0x10   :  { %p128_p8 = por %p127_p7, %p126_p6 }
  0x12   :  { %p129_p9 = pnand %p128_p8, %p122_p5 }
  0x14   :  { %132 = shalt.err (!%p129_p9)
}
  0x15   :  { %29 = dma.hbm_to_vmem [thread:$0]  %s190_s1, 32, %s27_s12, [#allocation6]  }
  0x16   :  { %153 = dma.done.wait [#allocation3], 32  }
  0x17   :  { %154 = vsyncadd [#allocation3], 4294967264 }
  0x18   :  { %155 = dma.done.wait [#allocation6], 32  }
  0x19   :  { %156 = vsyncadd [#allocation6], 4294967264  ;;  %v37_v0 = vld [vmem:[#allocation5] sm:$0x3]  ;;  %s161_s19 = smov 16   ;;  %s162_s20 = smov 48   ;;  %v62_v11 = vlaneseq }
  0x1a   :  { %39 = vrot.lane.b32.xlu0 %v37_v0, %s161_s19  ;;  %45 = vrot.lane.b32.xlu1 %v37_v0, %s162_s20  ;;  %s163_s0 = smov 32   ;;  %vm48_vm0 = vcmask 130048   ;;  %vm50_vm1 = vcmask 261120   ;;  %vm52_vm2 = vcmask 392192   ;;  %v36_v5 = vld [vmem:[#allocation2] sm:$0x3] }
  0x1b   :  { %vm56_vm3 = vcmask 517120   ;;  %v63_v12 = vand.u32 127, %v62_v11  ;;  %v65_v13 = vshrl.u32 %v62_v11, 7  ;;  %s164_s1 = smov [#allocation7]   ;;  %vm69_vm4 = vcmask 8192  }
  0x1c   :  { %s77_s21 = sshll.u32 %s164_s1, 4  ;;  %s78_s21 = int_to_ptr.vmem [resolvable:$true] %s77_s21 }
  0x1d   :  { %v66_v14 = vsub.s32 %v63_v12, %v65_v13  ;;  %s133_s22 = scalar_lea.vmem %s78_s21, 16  ;;  %s137_s23 = scalar_lea.vmem %s78_s21, 32 }
  0x1e   :  { %42 = vrot.lane.b32.xlu0 %v37_v0, %s163_s0  ;;  %p134_p10 = scmp.ne.s32.totalorder %s78_s21, %s133_s22  ;;  %p138_p11 = scmp.lt.s32.totalorder %s78_s21, %s78_s21 }
  0x1f   :  { %p139_p12 = scmp.lt.s32.totalorder %s137_s23, %s133_s22 }
  0x21   :  { %p140_p13 = por %p139_p12, %p138_p11 }
  0x23   :  { %p141_p0 = pnand %p140_p13, %p134_p10 }
  0x8c   :  { %v40_v1 = vpop.permute.xlu0 %39  ;;  %v46_v2 = vpop.permute.xlu1 %45 }
  0x8d   :  { %v49_v3 = vsel %vm48_vm0, %v37_v0, %v40_v1 }
  0x90   :  { %v43_v4 = vpop.permute.xlu0 %42 }
  0x91   :  { %v51_v6 = vsel %vm50_vm1, %v49_v3, %v43_v4 }
  0x92   :  { %v53_v7 = vsel %vm52_vm2, %v51_v6, %v46_v2 }
  0x93   :  { %v54_v8 = vsub.f32 %v36_v5, %v53_v7 }
  0x95   :  { %v55_v9 = vmul.f32 %v54_v8, %v54_v8 }
  0x97   :  { %v57_v10 = vsel %vm56_vm3, %v55_v9, 0.0 }
  0x98   :  { %58 = vadd.xlane.f32.xlu1 %v57_v10 }
 0x121   :  { %v59_v15 = vpop.xlane.xlu1 %58 }
 0x122   :  { %v60_v16 = vmul.f32 0.25, %v59_v15 }
 0x124   :  { %v67_v17 = vrot.slane %v60_v16, %v66_v14 }
 0x126   :  { %70 = vst.msk [vmem:[#allocation7] sm:$0x1] %vm69_vm4, %v67_v17 }
 0x127   :  { %144 = shalt.err (!%p141_p0)
}
 0x128   :  { %80 = dma.vmem_to_hbm [thread:$0]  %s78_s21, 16, %s191_s2, [#allocation4]  }
 0x129   :  { %157 = dma.done.wait [#allocation4], 16  }
 0x12a   :  { %158 = vsyncadd [#allocation4], 4294967280 }
 0x12b   :  { %84 = vsyncpa [#allocation3], 1 }
 0x12c   :  { %85 = vsyncpa [#allocation6], 1 }
 0x12d   :  { %86 = vsyncpa [#allocation4], 1 }

</bundles_post_ra>
